<compile_context>
chip_gen: v7x
topology: tpu7x:2x2x1
jax: 0.10.0
libtpu: 0.0.40
codegen_flags: <defaults>
</compile_context>

<pallas_src>
import functools

import jax
import jax.numpy as jnp
from jax.experimental import pallas as pl
from jax.experimental.pallas import tpu as pltpu


def gat_forward_kernel(x_ref, adjb_ref, w_ref, b_ref, pool_ref, out_ref, *,
                       num_conv_layers, src_lane, dst_lane, negative_slope=0.2):
    # Shapes (lane-padded to 128):
    #   x:    (N, FP)  f32
    #   adjb: (N, N)   f32   additive mask bias (0 on edges/self-loops, -1e30 off)
    #   w:    (L+2, FP, HP) bf16   conv weights (with folded att columns), w1, w2
    #   b:    (L+2, 1, HP)  f32    conv biases, b1, b2
    #   pool: (G, N)   bf16  one-hot graph-membership matrix
    #   out:  (G, HP)  f32
    adj_bias = adjb_ref[...]                            # (N, N) f32, read once
    h = x_ref[...]                                      # (N, FP) f32

    for l in range(num_conv_layers):                    # statically unrolled
        # lin(x); columns src_lane/dst_lane of W hold W @ att_src^T / W @ att_dst^T,
        # so the attention projections ride for free on this MXU pass.
        hl = jnp.dot(h.astype(jnp.bfloat16), w_ref[l],
                     preferred_element_type=jnp.float32)             # (N, HP)
        a_src = hl[:, src_lane:src_lane + 1]                          # (N, 1)
        a_dst = hl[:, dst_lane:dst_lane + 1]                          # (N, 1)

        # attention logits: e[i, j] = leaky_relu(a_dst[i] + a_src[j]) + mask bias
        e = a_dst + jnp.swapaxes(a_src, 0, 1)                         # (N, N)
        e = jnp.where(e > 0, e, negative_slope * e)                   # leaky_relu
        e = e + adj_bias                                              # masked logits

        # softmax over source nodes (per destination row); masked -> exactly 0
        e_max = jnp.max(e, axis=-1, keepdims=True)
        p = jnp.exp(e - e_max)
        attn = p * pl.reciprocal(jnp.sum(p, axis=-1, keepdims=True), approx=True)

        out = jnp.dot(attn.astype(jnp.bfloat16), hl.astype(jnp.bfloat16),
                      preferred_element_type=jnp.float32) + b_ref[l]
        # F.elu after every conv (module quirk reproduced); dropout = identity (eval).
        # exp(min(out, 0)) avoids inf in the discarded branch.
        h = jnp.where(out > 0, out, jnp.exp(jnp.minimum(out, 0.0)) - 1.0)

    # MLP: Linear -> ReLU -> Linear (all lane-padded), then global_add_pool.
    m = jnp.dot(h.astype(jnp.bfloat16), w_ref[num_conv_layers],
                preferred_element_type=jnp.float32) + b_ref[num_conv_layers]
    m = jnp.maximum(m, 0.0)
    y = jnp.dot(m.astype(jnp.bfloat16), w_ref[num_conv_layers + 1],
                preferred_element_type=jnp.float32) + b_ref[num_conv_layers + 1]
    # global_add_pool via bf16 one-hot matmul (exact for 0/1 pool), f32 accumulate.
    out_ref[...] = jnp.dot(pool_ref[...], y.astype(jnp.bfloat16),
                           preferred_element_type=jnp.float32)


def gat_forward(x, adj_bias, weights, biases, pool, *, num_conv_layers,
                num_classes, src_lane, dst_lane):
    g, cp = pool.shape[0], weights.shape[-1]
    kernel = functools.partial(gat_forward_kernel,
                               num_conv_layers=num_conv_layers,
                               src_lane=src_lane, dst_lane=dst_lane)
    out_pad = pl.pallas_call(
        kernel,
        out_shape=jax.ShapeDtypeStruct((g, cp), jnp.float32),
        in_specs=[pl.BlockSpec(memory_space=pltpu.MemorySpace.VMEM)] * 5,
        out_specs=pl.BlockSpec(memory_space=pltpu.MemorySpace.VMEM),
    )(x, adj_bias, weights, biases, pool)
    return out_pad[:, :num_classes]   # strip class-dim lane padding (glue)


if __name__ == "__main__":
    num_features, hidden, num_layers, num_classes = 16, 32, 3, 4
    nodes_per_graph, num_graphs = 8, 2
    N = nodes_per_graph * num_graphs
    num_convs = num_layers - 1              # module builds num_layers-1 GATConvs
    LANES = 128
    FP = HP = LANES                         # lane-dense padded feature dims
    SRC_LANE, DST_LANE = hidden, hidden + 1  # padded columns carrying att proj.
    assert hidden + 2 <= HP

    def pad_to(a, shape):
        return jnp.pad(a, [(0, t - s) for s, t in zip(a.shape, shape)])

    # --- synthetic graph: a ring inside each graph, both edge directions ---
    srcs, dsts = [], []
    for g in range(num_graphs):
        base = g * nodes_per_graph
        for k in range(nodes_per_graph):
            a, b = base + k, base + (k + 1) % nodes_per_graph
            srcs += [a, b]
            dsts += [b, a]
    edge_index = jnp.array([srcs, dsts], dtype=jnp.int32)            # (2, E)
    batch = jnp.repeat(jnp.arange(num_graphs, dtype=jnp.int32), nodes_per_graph)

    # additive adjacency bias with self loops (glue, built in plain JAX)
    adj = jnp.zeros((N, N), jnp.bool_)
    adj = adj.at[edge_index[1], edge_index[0]].set(True)             # adj[dst, src]
    adj = adj.at[jnp.arange(N), jnp.arange(N)].set(True)             # add_self_loops
    adj_bias = jnp.where(adj, 0.0, -1e30).astype(jnp.float32)
    pool = (batch[None, :] == jnp.arange(num_graphs)[:, None]).astype(jnp.bfloat16)

    # --- deterministic parameter init (shapes from GATConv / Linear) ---
    def glorot(key, shape):
        fan_in, fan_out = shape[0], shape[-1]
        lim = (6.0 / (fan_in + fan_out)) ** 0.5
        return jax.random.uniform(key, shape, jnp.float32, -lim, lim)

    keys = jax.random.split(jax.random.PRNGKey(0), 16)
    x = jax.random.normal(keys[0], (N, num_features), jnp.float32)
    x_pad = pad_to(x, (N, FP))

    # Conv weights with the attention projections folded into padded columns.
    conv_ws, conv_bs = [], []
    dims = [(num_features, hidden)] + [(hidden, hidden)] * (num_layers - 2)
    for li, (fi, fo) in enumerate(dims):
        kw, ks, kd = jax.random.split(keys[1 + li], 3)
        w_real = glorot(kw, (fi, fo))           # GATConv.lin (bias=False)
        att_src = glorot(ks, (1, fo))           # att_src (1, heads=1, out)
        att_dst = glorot(kd, (1, fo))           # att_dst
        c_src = (w_real @ att_src.T)[:, 0]      # (fi,)
        c_dst = (w_real @ att_dst.T)[:, 0]
        w_pad = jnp.zeros((FP, HP), jnp.float32)
        w_pad = w_pad.at[:fi, :fo].set(w_real)
        w_pad = w_pad.at[:fi, SRC_LANE].set(c_src)
        w_pad = w_pad.at[:fi, DST_LANE].set(c_dst)
        conv_ws.append(w_pad)
        conv_bs.append(jnp.zeros((1, HP), jnp.float32))   # GATConv bias init = 0

    # MLP weights/biases (rows >= hidden are zero, which also annihilates the
    # contaminated SRC/DST padded lanes of the last conv output).
    w1 = pad_to(glorot(keys[8], (hidden, hidden)), (FP, HP))
    b1 = pad_to(jax.random.uniform(keys[10], (1, hidden), jnp.float32,
                                   -1.0 / hidden ** 0.5, 1.0 / hidden ** 0.5),
                (1, HP))
    w2 = pad_to(glorot(keys[9], (hidden, num_classes)), (FP, HP))
    b2 = pad_to(jax.random.uniform(keys[11], (1, num_classes), jnp.float32,
                                   -1.0 / hidden ** 0.5, 1.0 / hidden ** 0.5),
                (1, HP))

    weights = jnp.stack(conv_ws + [w1, w2]).astype(jnp.bfloat16)   # (L+2,128,128)
    biases = jnp.stack(conv_bs + [b1, b2])                         # (L+2,1,128) f32

    # --- fused forward: 2x GATConv(+ELU) -> MLP -> global_add_pool ---
    out = gat_forward(x_pad, adj_bias, weights, biases, pool,
                      num_conv_layers=num_convs, num_classes=num_classes,
                      src_lane=SRC_LANE, dst_lane=DST_LANE)

    out = jax.block_until_ready(out)
    assert out.shape == (num_graphs, num_classes) and out.dtype == jnp.float32
    assert bool(jnp.all(jnp.isfinite(out)))
    print("KERNEL_OK")
</pallas_src>

<mosaic_0001>
module attributes {stable_mosaic.version = 11 : i64} {
  func.func @gat_forward_kernel(%arg0: memref<16x128xf32, #tpu.memory_space<vmem>>, %arg1: memref<16x16xf32, #tpu.memory_space<vmem>>, %arg2: memref<4x128x128xbf16, #tpu.memory_space<vmem>>, %arg3: memref<4x1x128xf32, #tpu.memory_space<vmem>>, %arg4: memref<2x16xbf16, #tpu.memory_space<vmem>>, %arg5: memref<2x128xf32, #tpu.memory_space<vmem>>) attributes {dimension_semantics = [], scalar_prefetch = 0 : i64, scratch_operands = 0 : i64, tpu.core_type = #tpu.core_type<tc>} {
    %c0 = arith.constant 0 : index
    %c0_0 = arith.constant 0 : index
    %0 = vector.load %arg1[%c0, %c0_0] : memref<16x16xf32, #tpu.memory_space<vmem>>, vector<16x16xf32>
    %c0_1 = arith.constant 0 : index
    %c0_2 = arith.constant 0 : index
    %1 = vector.load %arg0[%c0_1, %c0_2] : memref<16x128xf32, #tpu.memory_space<vmem>>, vector<16x128xf32>
    %2 = arith.truncf %1 : vector<16x128xf32> to vector<16x128xbf16>
    %c0_3 = arith.constant 0 : index
    %c0_4 = arith.constant 0 : index
    %c0_5 = arith.constant 0 : index
    %3 = vector.load %arg2[%c0_3, %c0_4, %c0_5] : memref<4x128x128xbf16, #tpu.memory_space<vmem>>, vector<1x128x128xbf16>
    %4 = vector.shape_cast %3 : vector<1x128x128xbf16> to vector<128x128xbf16>
    %cst = arith.constant dense<0.000000e+00> : vector<16x128xf32>
    %5 = tpu.matmul %2, %4, %cst {dimension_numbers = #tpu.dot_dimension_numbers<[1], [0], [0], [1], [0, 0, 1, 1], [], []>} : vector<16x128xbf16>, vector<128x128xbf16>, vector<16x128xf32> -> vector<16x128xf32>
    %6 = vector.extract_strided_slice %5 {offsets = [0, 32], sizes = [16, 1], strides = [1, 1]} : vector<16x128xf32> to vector<16x1xf32>
    %7 = vector.extract_strided_slice %5 {offsets = [0, 33], sizes = [16, 1], strides = [1, 1]} : vector<16x128xf32> to vector<16x1xf32>
    %8 = tpu.transpose %6, [1, 0] : vector<16x1xf32> -> vector<1x16xf32>
    %9 = vector.broadcast %7 : vector<16x1xf32> to vector<16x16xf32>
    %10 = vector.broadcast %8 : vector<1x16xf32> to vector<16x16xf32>
    %11 = arith.addf %9, %10 : vector<16x16xf32>
    %cst_6 = arith.constant 0.000000e+00 : f32
    %12 = vector.broadcast %cst_6 : f32 to vector<16x16xf32>
    %13 = arith.cmpf ogt, %11, %12 : vector<16x16xf32>
    %cst_7 = arith.constant 2.000000e-01 : f32
    %14 = vector.broadcast %cst_7 : f32 to vector<16x16xf32>
    %15 = arith.mulf %14, %11 : vector<16x16xf32>
    %16 = arith.select %13, %11, %15 : vector<16x16xi1>, vector<16x16xf32>
    %17 = arith.addf %16, %0 : vector<16x16xf32>
    %cst_8 = arith.constant dense<0xFF800000> : vector<16xf32>
    %18 = vector.multi_reduction <maximumf>, %17, %cst_8 [1] : vector<16x16xf32> to vector<16xf32>
    %19 = vector.shape_cast %18 : vector<16xf32> to vector<16x1xf32>
    %20 = vector.broadcast %19 : vector<16x1xf32> to vector<16x16xf32>
    %21 = arith.subf %17, %20 : vector<16x16xf32>
    %22 = math.exp %21 : vector<16x16xf32>
    %cst_9 = arith.constant dense<0.000000e+00> : vector<16xf32>
    %23 = vector.multi_reduction <add>, %22, %cst_9 [1] : vector<16x16xf32> to vector<16xf32>
    %24 = vector.shape_cast %23 : vector<16xf32> to vector<16x1xf32>
    %25 = tpu.reciprocal %24 {approx = true} : vector<16x1xf32> -> vector<16x1xf32>
    %26 = vector.broadcast %25 : vector<16x1xf32> to vector<16x16xf32>
    %27 = arith.mulf %22, %26 : vector<16x16xf32>
    %28 = arith.truncf %27 : vector<16x16xf32> to vector<16x16xbf16>
    %29 = arith.truncf %5 : vector<16x128xf32> to vector<16x128xbf16>
    %cst_10 = arith.constant dense<0.000000e+00> : vector<16x128xf32>
    %30 = tpu.matmul %28, %29, %cst_10 {dimension_numbers = #tpu.dot_dimension_numbers<[1], [0], [0], [1], [0, 0, 1, 1], [], []>} : vector<16x16xbf16>, vector<16x128xbf16>, vector<16x128xf32> -> vector<16x128xf32>
    %c0_11 = arith.constant 0 : index
    %c0_12 = arith.constant 0 : index
    %c0_13 = arith.constant 0 : index
    %31 = vector.load %arg3[%c0_11, %c0_12, %c0_13] : memref<4x1x128xf32, #tpu.memory_space<vmem>>, vector<1x1x128xf32>
    %32 = vector.shape_cast %31 : vector<1x1x128xf32> to vector<1x128xf32>
    %33 = vector.broadcast %32 : vector<1x128xf32> to vector<16x128xf32>
    %34 = arith.addf %30, %33 : vector<16x128xf32>
    %cst_14 = arith.constant 0.000000e+00 : f32
    %35 = vector.broadcast %cst_14 : f32 to vector<16x128xf32>
    %36 = arith.cmpf ogt, %34, %35 : vector<16x128xf32>
    %cst_15 = arith.constant 0.000000e+00 : f32
    %37 = vector.broadcast %cst_15 : f32 to vector<16x128xf32>
    %38 = arith.minimumf %34, %37 : vector<16x128xf32>
    %39 = math.exp %38 : vector<16x128xf32>
    %cst_16 = arith.constant 1.000000e+00 : f32
    %40 = vector.broadcast %cst_16 : f32 to vector<16x128xf32>
    %41 = arith.subf %39, %40 : vector<16x128xf32>
    %42 = arith.select %36, %34, %41 : vector<16x128xi1>, vector<16x128xf32>
    %43 = arith.truncf %42 : vector<16x128xf32> to vector<16x128xbf16>
    %c1 = arith.constant 1 : index
    %c0_17 = arith.constant 0 : index
    %c0_18 = arith.constant 0 : index
    %44 = vector.load %arg2[%c1, %c0_17, %c0_18] : memref<4x128x128xbf16, #tpu.memory_space<vmem>>, vector<1x128x128xbf16>
    %45 = vector.shape_cast %44 : vector<1x128x128xbf16> to vector<128x128xbf16>
    %cst_19 = arith.constant dense<0.000000e+00> : vector<16x128xf32>
    %46 = tpu.matmul %43, %45, %cst_19 {dimension_numbers = #tpu.dot_dimension_numbers<[1], [0], [0], [1], [0, 0, 1, 1], [], []>} : vector<16x128xbf16>, vector<128x128xbf16>, vector<16x128xf32> -> vector<16x128xf32>
    %47 = vector.extract_strided_slice %46 {offsets = [0, 32], sizes = [16, 1], strides = [1, 1]} : vector<16x128xf32> to vector<16x1xf32>
    %48 = vector.extract_strided_slice %46 {offsets = [0, 33], sizes = [16, 1], strides = [1, 1]} : vector<16x128xf32> to vector<16x1xf32>
    %49 = tpu.transpose %47, [1, 0] : vector<16x1xf32> -> vector<1x16xf32>
    %50 = vector.broadcast %48 : vector<16x1xf32> to vector<16x16xf32>
    %51 = vector.broadcast %49 : vector<1x16xf32> to vector<16x16xf32>
    %52 = arith.addf %50, %51 : vector<16x16xf32>
    %cst_20 = arith.constant 0.000000e+00 : f32
    %53 = vector.broadcast %cst_20 : f32 to vector<16x16xf32>
    %54 = arith.cmpf ogt, %52, %53 : vector<16x16xf32>
    %cst_21 = arith.constant 2.000000e-01 : f32
    %55 = vector.broadcast %cst_21 : f32 to vector<16x16xf32>
    %56 = arith.mulf %55, %52 : vector<16x16xf32>
    %57 = arith.select %54, %52, %56 : vector<16x16xi1>, vector<16x16xf32>
    %58 = arith.addf %57, %0 : vector<16x16xf32>
    %cst_22 = arith.constant dense<0xFF800000> : vector<16xf32>
    %59 = vector.multi_reduction <maximumf>, %58, %cst_22 [1] : vector<16x16xf32> to vector<16xf32>
    %60 = vector.shape_cast %59 : vector<16xf32> to vector<16x1xf32>
    %61 = vector.broadcast %60 : vector<16x1xf32> to vector<16x16xf32>
    %62 = arith.subf %58, %61 : vector<16x16xf32>
    %63 = math.exp %62 : vector<16x16xf32>
    %cst_23 = arith.constant dense<0.000000e+00> : vector<16xf32>
    %64 = vector.multi_reduction <add>, %63, %cst_23 [1] : vector<16x16xf32> to vector<16xf32>
    %65 = vector.shape_cast %64 : vector<16xf32> to vector<16x1xf32>
    %66 = tpu.reciprocal %65 {approx = true} : vector<16x1xf32> -> vector<16x1xf32>
    %67 = vector.broadcast %66 : vector<16x1xf32> to vector<16x16xf32>
    %68 = arith.mulf %63, %67 : vector<16x16xf32>
    %69 = arith.truncf %68 : vector<16x16xf32> to vector<16x16xbf16>
    %70 = arith.truncf %46 : vector<16x128xf32> to vector<16x128xbf16>
    %cst_24 = arith.constant dense<0.000000e+00> : vector<16x128xf32>
    %71 = tpu.matmul %69, %70, %cst_24 {dimension_numbers = #tpu.dot_dimension_numbers<[1], [0], [0], [1], [0, 0, 1, 1], [], []>} : vector<16x16xbf16>, vector<16x128xbf16>, vector<16x128xf32> -> vector<16x128xf32>
    %c1_25 = arith.constant 1 : index
    %c0_26 = arith.constant 0 : index
    %c0_27 = arith.constant 0 : index
    %72 = vector.load %arg3[%c1_25, %c0_26, %c0_27] : memref<4x1x128xf32, #tpu.memory_space<vmem>>, vector<1x1x128xf32>
    %73 = vector.shape_cast %72 : vector<1x1x128xf32> to vector<1x128xf32>
    %74 = vector.broadcast %73 : vector<1x128xf32> to vector<16x128xf32>
    %75 = arith.addf %71, %74 : vector<16x128xf32>
    %cst_28 = arith.constant 0.000000e+00 : f32
    %76 = vector.broadcast %cst_28 : f32 to vector<16x128xf32>
    %77 = arith.cmpf ogt, %75, %76 : vector<16x128xf32>
    %cst_29 = arith.constant 0.000000e+00 : f32
    %78 = vector.broadcast %cst_29 : f32 to vector<16x128xf32>
    %79 = arith.minimumf %75, %78 : vector<16x128xf32>
    %80 = math.exp %79 : vector<16x128xf32>
    %cst_30 = arith.constant 1.000000e+00 : f32
    %81 = vector.broadcast %cst_30 : f32 to vector<16x128xf32>
    %82 = arith.subf %80, %81 : vector<16x128xf32>
    %83 = arith.select %77, %75, %82 : vector<16x128xi1>, vector<16x128xf32>
    %84 = arith.truncf %83 : vector<16x128xf32> to vector<16x128xbf16>
    %c2 = arith.constant 2 : index
    %c0_31 = arith.constant 0 : index
    %c0_32 = arith.constant 0 : index
    %85 = vector.load %arg2[%c2, %c0_31, %c0_32] : memref<4x128x128xbf16, #tpu.memory_space<vmem>>, vector<1x128x128xbf16>
    %86 = vector.shape_cast %85 : vector<1x128x128xbf16> to vector<128x128xbf16>
    %cst_33 = arith.constant dense<0.000000e+00> : vector<16x128xf32>
    %87 = tpu.matmul %84, %86, %cst_33 {dimension_numbers = #tpu.dot_dimension_numbers<[1], [0], [0], [1], [0, 0, 1, 1], [], []>} : vector<16x128xbf16>, vector<128x128xbf16>, vector<16x128xf32> -> vector<16x128xf32>
    %c2_34 = arith.constant 2 : index
    %c0_35 = arith.constant 0 : index
    %c0_36 = arith.constant 0 : index
    %88 = vector.load %arg3[%c2_34, %c0_35, %c0_36] : memref<4x1x128xf32, #tpu.memory_space<vmem>>, vector<1x1x128xf32>
    %89 = vector.shape_cast %88 : vector<1x1x128xf32> to vector<1x128xf32>
    %90 = vector.broadcast %89 : vector<1x128xf32> to vector<16x128xf32>
    %91 = arith.addf %87, %90 : vector<16x128xf32>
    %cst_37 = arith.constant 0.000000e+00 : f32
    %92 = vector.broadcast %cst_37 : f32 to vector<16x128xf32>
    %93 = arith.maximumf %91, %92 : vector<16x128xf32>
    %94 = arith.truncf %93 : vector<16x128xf32> to vector<16x128xbf16>
    %c3 = arith.constant 3 : index
    %c0_38 = arith.constant 0 : index
    %c0_39 = arith.constant 0 : index
    %95 = vector.load %arg2[%c3, %c0_38, %c0_39] : memref<4x128x128xbf16, #tpu.memory_space<vmem>>, vector<1x128x128xbf16>
    %96 = vector.shape_cast %95 : vector<1x128x128xbf16> to vector<128x128xbf16>
    %cst_40 = arith.constant dense<0.000000e+00> : vector<16x128xf32>
    %97 = tpu.matmul %94, %96, %cst_40 {dimension_numbers = #tpu.dot_dimension_numbers<[1], [0], [0], [1], [0, 0, 1, 1], [], []>} : vector<16x128xbf16>, vector<128x128xbf16>, vector<16x128xf32> -> vector<16x128xf32>
    %c3_41 = arith.constant 3 : index
    %c0_42 = arith.constant 0 : index
    %c0_43 = arith.constant 0 : index
    %98 = vector.load %arg3[%c3_41, %c0_42, %c0_43] : memref<4x1x128xf32, #tpu.memory_space<vmem>>, vector<1x1x128xf32>
    %99 = vector.shape_cast %98 : vector<1x1x128xf32> to vector<1x128xf32>
    %100 = vector.broadcast %99 : vector<1x128xf32> to vector<16x128xf32>
    %101 = arith.addf %97, %100 : vector<16x128xf32>
    %c0_44 = arith.constant 0 : index
    %c0_45 = arith.constant 0 : index
    %102 = vector.load %arg4[%c0_44, %c0_45] : memref<2x16xbf16, #tpu.memory_space<vmem>>, vector<2x16xbf16>
    %103 = arith.truncf %101 : vector<16x128xf32> to vector<16x128xbf16>
    %cst_46 = arith.constant dense<0.000000e+00> : vector<2x128xf32>
    %104 = tpu.matmul %102, %103, %cst_46 {dimension_numbers = #tpu.dot_dimension_numbers<[1], [0], [0], [1], [0, 0, 1, 1], [], []>} : vector<2x16xbf16>, vector<16x128xbf16>, vector<2x128xf32> -> vector<2x128xf32>
    %c0_47 = arith.constant 0 : index
    %c0_48 = arith.constant 0 : index
    %105 = vector.load %arg5[%c0_47, %c0_48] : memref<2x128xf32, #tpu.memory_space<vmem>>, vector<2x128xf32>
    tpu.vector_store %arg5[%c0_47, %c0_48], %104 {strides = array<i32>} : memref<2x128xf32, #tpu.memory_space<vmem>>, vector<2x128xf32>,
    return
  }
}

</mosaic_0001>

<bundles_post_ra>
// kernel: tpu_custom_call.1
= control target key start
LH: loop header
LB: loop body
LE: loop exit
PB: predicated region body
PF: predicated region fallthrough
CT: control target
= control target key end

     0   :  { %10 = vsyncpa [#allocation3], 0  ;;  %s1415_s0 = inlined_call_operand.hbm [shape: f32[16,128], index: 0, kind: input, shape index: {}]   ;;  %s1416_s1 = inlined_call_operand.hbm [shape: f32[16,16], index: 1, kind: input, shape index: {}]   ;;  %s1417_s2 = inlined_call_operand.hbm [shape: bf16[4,128,128], index: 2, kind: input, shape index: {}]   ;;  %s1418_s3 = inlined_call_operand.vmem [shape: f32[4,1,128], index: 3, kind: input, shape index: {}]   ;;  %s1419_s4 = inlined_call_operand.vmem [shape: bf16[2,16], index: 4, kind: input, shape index: {}]   ;;  %s1420_s5 = inlined_call_operand.hbm [shape: f32[2,128], index: 5, kind: output, shape index: {}]  }
   0x1   :  { %11 = vsyncpa [#allocation6], 0 }
   0x2   :  { %12 = vsyncpa [#allocation4], 0  ;;  %s1224_s18 = smov [#allocation5]   ;;  %s1225_s20 = smov [#allocation2]  }
   0x3   :  { %s30_s19 = sshll.u32 %s1224_s18, 4  ;;  %s18_s21 = sshll.u32 %s1225_s20, 4  ;;  %s31_s19 = int_to_ptr.vmem [resolvable:$true] %s30_s19  ;;  %s1266_s21 = int_to_ptr.vmem [resolvable:$true] %s18_s21 }
   0x4   :  { %s1130_s24 = scalar_lea.hbm %s1416_s1, 256 }
   0x5   :  { %p1131_p0 = scmp.ne.s32.totalorder %s1416_s1, %s1130_s24  ;;  %p1134_p1 = scmp.lt.u32.totalorder %s1130_s24, %s1416_s1 }
   0x7   :  { %p1136_p2 = pnand %p1134_p1, %p1131_p0 }
   0x9   :  { %1139 = shalt.err (!%p1136_p2)
}
   0xa   :  { %s1140_s29 = scalar_lea.vmem %s31_s19, 256  ;;  %p1145_p4 = scmp.lt.s32.totalorder %s31_s19, %s31_s19 }
   0xb   :  { %p1141_p3 = scmp.ne.s32.totalorder %s31_s19, %s1140_s29  ;;  %p1146_p5 = scmp.lt.s32.totalorder %s1140_s29, %s1140_s29 }
   0xd   :  { %p1147_p6 = por %p1146_p5, %p1145_p4 }
   0xf   :  { %p1148_p7 = pnand %p1147_p6, %p1141_p3 }
  0x11   :  { %1151 = shalt.err (!%p1148_p7)
}
  0x12   :  { %s1226_s30 = smov 128   ;;  %s1227_s6 = smov 8  }
  0x13   :  { %36 = dma.hbm_to_vmem [thread:$0]  %s1416_s1, 256, %s31_s19, [#allocation6], %s1226_s30, %s1226_s30, %s1227_s6  }
  0x14   :  { %s1152_s11 = scalar_lea.hbm %s1415_s0, 256 }
  0x15   :  { %p1153_p8 = scmp.ne.s32.totalorder %s1415_s0, %s1152_s11  ;;  %p1156_p9 = scmp.lt.u32.totalorder %s1152_s11, %s1415_s0 }
  0x17   :  { %p1158_p10 = pnand %p1156_p9, %p1153_p8 }
  0x19   :  { %1161 = shalt.err (!%p1158_p10)
}
  0x1a   :  { %s1162_s16 = scalar_lea.vmem %s1266_s21, 256  ;;  %p1167_p12 = scmp.lt.s32.totalorder %s1266_s21, %s1266_s21 }
  0x1b   :  { %p1163_p11 = scmp.ne.s32.totalorder %s1266_s21, %s1162_s16  ;;  %p1168_p13 = scmp.lt.s32.totalorder %s1162_s16, %s1162_s16 }
  0x1d   :  { %p1169_p0 = por %p1168_p13, %p1167_p12 }
  0x1f   :  { %p1170_p1 = pnand %p1169_p0, %p1163_p11 }
  0x21   :  { %1173 = shalt.err (!%p1170_p1)
}
  0x22   :  { %24 = dma.hbm_to_vmem [thread:$0]  %s1415_s0, 256, %s1266_s21, [#allocation3], %s1226_s30, %s1226_s30, %s1227_s6  }
  0x23   :  { %s1228_s18 = smov [#allocation7]   ;;  %s1174_s23 = scalar_lea.hbm %s1417_s2, 4096 }
  0x24   :  { %s42_s19 = sshll.u32 %s1228_s18, 4  ;;  %p1175_p2 = scmp.ne.s32.totalorder %s1417_s2, %s1174_s23  ;;  %s43_s19 = int_to_ptr.vmem [resolvable:$true] %s42_s19 }
  0x25   :  { %p1178_p3 = scmp.lt.u32.totalorder %s1174_s23, %s1417_s2 }
  0x27   :  { %p1180_p4 = pnand %p1178_p3, %p1175_p2 }
  0x29   :  { %1183 = shalt.err (!%p1180_p4)
}
  0x2a   :  { %s1184_s28 = scalar_lea.vmem %s43_s19, 4096  ;;  %p1189_p6 = scmp.lt.s32.totalorder %s43_s19, %s43_s19 }
  0x2b   :  { %p1185_p5 = scmp.ne.s32.totalorder %s43_s19, %s1184_s28  ;;  %p1190_p7 = scmp.lt.s32.totalorder %s1184_s28, %s1184_s28 }
  0x2d   :  { %p1191_p8 = por %p1190_p7, %p1189_p6 }
  0x2f   :  { %p1192_p9 = pnand %p1191_p8, %p1185_p5 }
  0x31   :  { %1195 = shalt.err (!%p1192_p9)
}
  0x32   :  { %s1229_s0 = smov 64   ;;  %s1230_s21 = smov 4  }
  0x33   :  { %48 = dma.hbm_to_vmem [thread:$0]  %s1417_s2, 4096, %s43_s19, [#allocation6], %s1229_s0, %s1229_s0, %s1230_s21  }
  0x34   :  { %1218 = dma.done.wait [#allocation3], 256  }
  0x35   :  { %1219 = vsyncadd [#allocation3], 4294967040 }
  0x36   :  { %1220 = dma.done.wait [#allocation6], 4352  }
  0x37   :  { %1221 = vsyncadd [#allocation6], 4294962944  ;;  %v1231_v0 = vmov 0.0   ;;  %vm1232_vm0 = vmmov 0   ;;  %v1233_v1 = vmov 33   ;;  %v1074_v2 = vld [vmem:[#allocation7] sm:$0xff]   ;;  %v221_v20 = vlaneseq }
  0x38   :  { %962 = vmatprep.subr.bf16.mxu0 %v1231_v0  ;;  %978 = vmatprep.mubr.msk.bf16.mxu0 %vm1232_vm0, %v1231_v0  ;;  %v1075_v3 = vld [vmem:[#allocation7 + $0x8] sm:$0xff]   ;;  %v1076_v4 = vld [vmem:[#allocation7 + $0x10] sm:$0xff]   ;;  %v1077_v5 = vld [vmem:[#allocation7 + $0x18] sm:$0xff]   ;;  %s1234_s2 = smov 96   ;;  %vm235_vm3 = vcmask 130048   ;;  %s1235_s16 = smov [#allocation8]  }
  0x39   :  { %1072 = vset.pattern.permute.xlu1 %v1233_v1  ;;  %982 = vmatprep.subr.bf16.mxu1 %v1231_v0  ;;  %v1078_v6 = vld [vmem:[#allocation7 + $0x20] sm:$0xff]   ;;  %v1079_v7 = vld [vmem:[#allocation7 + $0x28] sm:$0xff]   ;;  %v1080_v8 = vld [vmem:[#allocation7 + $0x30] sm:$0xff]   ;;  %v1328_v21 = vshrl.u32 %v221_v20, 7  ;;  %s864_s1 = sshll.u32 %s1235_s16, 4  ;;  %s865_s1 = int_to_ptr.vmem [resolvable:$true] %s864_s1 }
  0x3a   :  { %984 = vmatprep.mubr.msk.bf16.mxu1 %vm1232_vm0, %v1231_v0  ;;  %963 = vmatpush3.bf16.msra.mxu0 %v1074_v2  ;;  %v1081_v9 = vld [vmem:[#allocation7 + $0x38] sm:$0xff]   ;;  %v65_v10 = vld [vmem:[#allocation2] sm:$0xff]  ;;  %v66_v11 = vld [vmem:[#allocation2 + $0x8] sm:$0xff]  ;;  %p1201_p11 = scmp.lt.s32.totalorder %s865_s1, %s865_s1 }
  0x3b   :  { %964 = vmatprep.subr.bf16.mxu0 %v1231_v0  ;;  %v67_v12 = vpack.c.bf16 %v66_v11, %v65_v10  ;;  %v223_v23 = vsub.s32 0, %v1328_v21  ;;  %v1333_v29 = vld [vmem:[#allocation5 + $0x8] sm:$0xff]  ;;  %v1335_v30 = vld [vmem:[#allocation5] sm:$0xff]  ;;  %v1082_v55 = vld [vmem:[#allocation7 + $0x40] sm:$0xff]  }
  0x3c   :  { %v1083_v57 = vld [vmem:[#allocation7 + $0x48] sm:$0xff]   ;;  %v1084_v58 = vld [vmem:[#allocation7 + $0x50] sm:$0xff]   ;;  %v1085_v59 = vld [vmem:[#allocation7 + $0x58] sm:$0xff]  }
  0x3d   :  { %v1086_v60 = vld [vmem:[#allocation7 + $0x60] sm:$0xff]   ;;  %v1087_v61 = vld [vmem:[#allocation7 + $0x68] sm:$0xff]   ;;  %v1088_v62 = vld [vmem:[#allocation7 + $0x70] sm:$0xff]  }
  0x3e   :  { %965 = vmatpush3.bf16.msra.mxu0 %v1075_v3  ;;  %v1089_v63 = vld [vmem:[#allocation7 + $0x78] sm:$0xff]  }
  0x3f   :  { %966 = vmatprep.subr.bf16.mxu0 %v1231_v0 }
  0x42   :  { %967 = vmatpush3.bf16.msra.mxu0 %v1076_v4 }
  0x43   :  { %968 = vmatprep.subr.bf16.mxu0 %v1231_v0 }
  0x46   :  { %969 = vmatpush3.bf16.msra.mxu0 %v1077_v5 }
  0x47   :  { %970 = vmatprep.subr.bf16.mxu0 %v1231_v0 }
  0x4a   :  { %971 = vmatpush3.bf16.msra.mxu0 %v1078_v6 }
  0x4b   :  { %972 = vmatprep.subr.bf16.mxu0 %v1231_v0 }
  0x4e   :  { %973 = vmatpush3.bf16.msra.mxu0 %v1079_v7 }
  0x4f   :  { %974 = vmatprep.subr.bf16.mxu0 %v1231_v0 }
  0x52   :  { %975 = vmatpush3.bf16.msra.mxu0 %v1080_v8 }
  0x53   :  { %976 = vmatprep.subr.bf16.mxu0 %v1231_v0 }
  0x56   :  { %977 = vmatpush3.bf16.msra.mxu0 %v1081_v9 }
  0x57   :  { %1008 = vmatprep.subr.bf16.mxu0 %v1231_v0 }
  0x59   :  { %979 = vmatmul.mubr.bf16.vlgmr.msra.gmra.mrb[0].mxu0 %v67_v12 }
  0x5a   :  { %1010 = vmatprep.mubr.msk.bf16.mxu0 %vm1232_vm0, %v1231_v0 }
 0x12c   :  { %v166_v13 = vpop.f32.mrb[0].mxu0 }
 0x12d   :  { %214 = vperm.xlu1 %1072, %v166_v13   ;;  %175 = vrot.lane.b32.xlu0 %v166_v13, %s1234_s2  ;;  %v980_v14 = vpop.f32.mrb[1].mxu0 }
 0x12e   :  { %v169_v15 = vpop.f32.mrb[2].mxu0 }
 0x12f   :  { %v981_v16 = vpop.f32.mrb[3].mxu0  ;;  %v259_v17 = vpack.c.bf16 %v169_v15, %v166_v13 }
 0x131   :  { %218 = vperm.xlu1 %1072, %v169_v15   ;;  %177 = vrot.lane.b32.xlu0 %v169_v15, %s1234_s2 }
 0x132   :  { %983 = vmatpush3.bf16.msra.mxu1 %v259_v17 }
 0x133   :  { %988 = vmatprep.subr.bf16.mxu1 %v1231_v0 }
 0x19f   :  { %v176_v18 = vpop.permute.xlu0 %175 }
 0x1a0   :  { %181 = vxpose.xlu0.b32.start [1/2] (short) (narrow) %v176_v18, 8 }
 0x1a3   :  { %v178_v19 = vpop.permute.xlu0 %177 }
 0x1a4   :  { %182 = vxpose.xlu0.b32.end [2/2] (short) (narrow) %v178_v19, 8 }
 0x1ac   :  { %v215_v22 = vpop.permute.xlu1 %214 }
 0x1b0   :  { %v219_v26 = vpop.permute.xlu1 %218 }
 0x1cd   :  { %1073 = vset.pattern.permute.xlu0 %v1233_v1  ;;  %v882_v1 = vld [vmem:[%s1418_s3] ss:$0 sm:$0xff] }
 0x220   :  { %v197_v24 = vpop.trf.xlu0 }
 0x221   :  { %v224_v25 = vrot.slane %v197_v24, %v223_v23 }
 0x223   :  { %v225_v27 = vadd.f32 %v224_v25, %v215_v22  ;;  %v226_v28 = vadd.f32 %v224_v25, %v219_v26 }
 0x225   :  { %v229_v31 = vmul.f32 0.2, %v225_v27  ;;  %v230_v32 = vmul.f32 0.2, %v226_v28  ;;  %vm228_vm1 = vcmp.gt.f32.partialorder %v226_v28, 0.0  ;;  %vm227_vm2 = vcmp.gt.f32.partialorder %v225_v27, 0.0 }
 0x227   :  { %v232_v33 = vsel %vm228_vm1, %v226_v28, %v230_v32  ;;  %v231_v34 = vsel %vm227_vm2, %v225_v27, %v229_v31 }
 0x228   :  { %v234_v35 = vadd.f32 %v232_v33, %v1333_v29  ;;  %v233_v36 = vadd.f32 %v231_v34, %v1335_v30 }
 0x22a   :  { %v239_v37 = vsel %vm235_vm3, %v234_v35, -inf  ;;  %v236_v38 = vsel %vm235_vm3, %v233_v36, -inf }
 0x22b   :  { %240 = vmax.xlane.f32.xlu0 %v239_v37  ;;  %237 = vmax.xlane.f32.xlu1 %v236_v38 }
 0x2b8   :  { %v241_v39 = vpop.xlane.xlu0 %240  ;;  %v238_v40 = vpop.xlane.xlu1 %237 }
 0x2b9   :  { %v243_v41 = vsub.f32 %v234_v35, %v241_v39  ;;  %v242_v42 = vsub.f32 %v233_v36, %v238_v40 }
 0x2bb   :  { %v244_v43 = vmul.f32 1.442695, %v242_v42  ;;  %v246_v44 = vmul.f32 1.442695, %v243_v41 }
 0x2bd   :  { %1106 = vpow2.f32 %v244_v43 }
 0x2be   :  { %1108 = vpow2.f32 %v246_v44 }
 0x2c7   :  { %v1107_v45 = vpop.eup %1106 }
 0x2c8   :  { %v248_v46 = vsel %vm235_vm3, %v1107_v45, 0.0  ;;  %v1109_v47 = vpop.eup %1108 }
 0x2c9   :  { %249 = vadd.xlane.f32.xlu1 %v248_v46  ;;  %v251_v48 = vsel %vm235_vm3, %v1109_v47, 0.0 }
 0x2cd   :  { %252 = vadd.xlane.f32.xlu1 %v251_v48 }
 0x356   :  { %v250_v49 = vpop.xlane.xlu1 %249 }
 0x357   :  { %1110 = vrcp.f32 %v250_v49 }
 0x35a   :  { %v253_v50 = vpop.xlane.xlu1 %252 }
 0x35b   :  { %1112 = vrcp.f32 %v253_v50 }
 0x361   :  { %v1111_v51 = vpop.eup %1110 }
 0x362   :  { %v256_v53 = vmul.f32 %v1111_v51, %v1107_v45  ;;  %v1091_v51 = vld [vmem:[#allocation7 + $0x88] sm:$0xff]  }
 0x365   :  { %v1113_v52 = vpop.eup %1112 }
 0x366   :  { %v257_v54 = vmul.f32 %v1113_v52, %v1109_v47 }
 0x368   :  { %v258_v56 = vpack.c.bf16 %v257_v54, %v256_v53 }
 0x36a   :  { %985 = vmatmul.mubr.msk.bf16.vlgmr.msra.gmra.mrb[0].mxu1 %vm235_vm3, %v258_v56 }
 0x36b   :  { %989 = vmatpush3.bf16.msra.mxu1 %v1082_v55  ;;  %1004 = vmatprep.mubr.msk.bf16.mxu1 %vm1232_vm0, %v1231_v0 }
 0x36c   :  { %990 = vmatprep.subr.bf16.mxu1 %v1231_v0 }
 0x36f   :  { %991 = vmatpush3.bf16.msra.mxu1 %v1083_v57 }
 0x370   :  { %992 = vmatprep.subr.bf16.mxu1 %v1231_v0 }
 0x373   :  { %993 = vmatpush3.bf16.msra.mxu1 %v1084_v58 }
 0x374   :  { %994 = vmatprep.subr.bf16.mxu1 %v1231_v0 }
 0x377   :  { %995 = vmatpush3.bf16.msra.mxu1 %v1085_v59  ;;  %v1092_v59 = vld [vmem:[#allocation7 + $0x90] sm:$0xff]  }
 0x378   :  { %996 = vmatprep.subr.bf16.mxu1 %v1231_v0 }
 0x37b   :  { %997 = vmatpush3.bf16.msra.mxu1 %v1086_v60  ;;  %v1093_v60 = vld [vmem:[#allocation7 + $0x98] sm:$0xff]  }
 0x37c   :  { %998 = vmatprep.subr.bf16.mxu1 %v1231_v0 }
 0x37f   :  { %999 = vmatpush3.bf16.msra.mxu1 %v1087_v61  ;;  %v1094_v61 = vld [vmem:[#allocation7 + $0xa0] sm:$0xff]  }
 0x380   :  { %1000 = vmatprep.subr.bf16.mxu1 %v1231_v0 }
 0x383   :  { %1001 = vmatpush3.bf16.msra.mxu1 %v1088_v62  ;;  %v1095_v62 = vld [vmem:[#allocation7 + $0xa8] sm:$0xff]  }
 0x384   :  { %1002 = vmatprep.subr.bf16.mxu1 %v1231_v0 }
 0x387   :  { %1003 = vmatpush3.bf16.msra.mxu1 %v1089_v63  ;;  %v1096_v63 = vld [vmem:[#allocation7 + $0xb0] sm:$0xff]  }
 0x388   :  { %1014 = vmatprep.subr.bf16.mxu1 %v1231_v0 }
 0x43d   :  { %v304_v2 = vpop.f32.mrb[0].mxu1 }
 0x43e   :  { %v305_v3 = vadd.f32 %v882_v1, %v304_v2  ;;  %v986_v4 = vpop.f32.mrb[1].mxu1  ;;  %v1098_v2 = vld [vmem:[#allocation7 + $0xc0] sm:$0xff]  }
 0x43f   :  { %v307_v5 = vpop.f32.mrb[2].mxu1  ;;  %v1100_v4 = vld [vmem:[#allocation7 + $0xd0] sm:$0xff]  }
 0x440   :  { %v313_v6 = vmin.f32 %v305_v3, 0.0  ;;  %v308_v7 = vadd.f32 %v882_v1, %v307_v5  ;;  %v987_v8 = vpop.f32.mrb[3].mxu1  ;;  %vm311_vm4 = vcmp.gt.f32.partialorder %v305_v3, 0.0  ;;  %v1097_v1 = vld [vmem:[#allocation7 + $0xb8] sm:$0xff]  }
 0x441   :  { %v1101_v5 = vld [vmem:[#allocation7 + $0xd8] sm:$0xff]   ;;  %v895_v8 = vld [vmem:[%s1418_s3 + $0x1] ss:$0 sm:$0xff] }
 0x442   :  { %v315_v9 = vmul.f32 1.442695, %v313_v6  ;;  %v314_v10 = vmin.f32 %v308_v7, 0.0  ;;  %vm312_vm5 = vcmp.gt.f32.partialorder %v308_v7, 0.0  ;;  %v1102_v6 = vld [vmem:[#allocation7 + $0xe0] sm:$0xff]  }
 0x444   :  { %1114 = vpow2.f32 %v315_v9  ;;  %v317_v11 = vmul.f32 1.442695, %v314_v10 }
 0x446   :  { %1116 = vpow2.f32 %v317_v11 }
 0x44e   :  { %v1115_v12 = vpop.eup %1114 }
 0x44f   :  { %v884_v13 = vadd.f32 -1.0, %v1115_v12 }
 0x450   :  { %v1117_v14 = vpop.eup %1116 }
 0x451   :  { %v885_v15 = vadd.f32 -1.0, %v1117_v14  ;;  %v321_v16 = vsel %vm311_vm4, %v305_v3, %v884_v13  ;;  %v1099_v3 = vld [vmem:[#allocation7 + $0xc8] sm:$0xff]  }
 0x453   :  { %v322_v17 = vsel %vm312_vm5, %v308_v7, %v885_v15  ;;  %v1103_v7 = vld [vmem:[#allocation7 + $0xe8] sm:$0xff]  }
 0x454   :  { %v323_v18 = vpack.c.bf16 %v322_v17, %v321_v16 }
 0x456   :  { %1005 = vmatmul.mubr.bf16.vlgmr.msra.gmra.mrb[4].mxu1 %v323_v18 }
 0x457   :  { %1030 = vmatprep.mubr.msk.bf16.mxu1 %vm1232_vm0, %v1231_v0 }
 0x529   :  { %v423_v19 = vpop.f32.mrb[4].mxu1 }
 0x52a   :  { %432 = vrot.lane.b32.xlu1 %v423_v19, %s1234_s2  ;;  %v1006_v20 = vpop.f32.mrb[5].mxu1 }
 0x52b   :  { %v426_v22 = vpop.f32.mrb[6].mxu1 }
 0x52c   :  { %v515_v24 = vpack.c.bf16 %v426_v22, %v423_v19  ;;  %v1007_v25 = vpop.f32.mrb[7].mxu1 }
 0x52e   :  { %434 = vrot.lane.b32.xlu1 %v426_v22, %s1234_s2  ;;  %1009 = vmatpush3.bf16.msra.mxu0 %v515_v24 }
 0x52f   :  { %1034 = vmatprep.subr.bf16.mxu0 %v1231_v0 }
 0x532   :  { %471 = vperm.xlu1 %1072, %v423_v19  }
 0x536   :  { %475 = vperm.xlu1 %1072, %v426_v22  }
 0x59c   :  { %v433_v26 = vpop.permute.xlu1 %432 }
 0x59d   :  { %438 = vxpose.xlu1.b32.start [1/2] (short) (narrow) %v433_v26, 8 }
 0x5a0   :  { %v435_v27 = vpop.permute.xlu1 %434 }
 0x5a1   :  { %439 = vxpose.xlu1.b32.end [2/2] (short) (narrow) %v435_v27, 8 }
 0x5b1   :  { %v472_v28 = vpop.permute.xlu1 %471 }
 0x5b5   :  { %v476_v31 = vpop.permute.xlu1 %475 }
 0x61d   :  { %v454_v32 = vpop.trf.xlu1 }
 0x61e   :  { %v481_v33 = vrot.slane %v454_v32, %v223_v23  ;;  %v900_v32 = vld [vmem:[%s1418_s3 + $0x2] ss:$0 sm:$0xff] }
 0x620   :  { %v482_v34 = vadd.f32 %v481_v33, %v472_v28  ;;  %v483_v35 = vadd.f32 %v481_v33, %v476_v31  ;;  %v1104_v28 = vld [vmem:[#allocation7 + $0xf0] sm:$0xff]   ;;  %v1105_v31 = vld [vmem:[#allocation7 + $0xf8] sm:$0xff]  }
 0x622   :  { %v486_v36 = vmul.f32 0.2, %v482_v34  ;;  %v487_v37 = vmul.f32 0.2, %v483_v35  ;;  %vm484_vm6 = vcmp.gt.f32.partialorder %v482_v34, 0.0  ;;  %vm485_vm7 = vcmp.gt.f32.partialorder %v483_v35, 0.0 }
 0x624   :  { %v488_v38 = vsel %vm484_vm6, %v482_v34, %v486_v36  ;;  %v489_v39 = vsel %vm485_vm7, %v483_v35, %v487_v37 }
 0x625   :  { %v490_v40 = vadd.f32 %v488_v38, %v1335_v30  ;;  %v491_v42 = vadd.f32 %v489_v39, %v1333_v29  ;;  %v1090_v29 = vld [vmem:[#allocation7 + $0x80] sm:$0xff]  }
 0x626   :  { %1015 = vmatpush3.bf16.msra.mxu1 %v1090_v29 }
 0x627   :  { %v492_v41 = vsel %vm235_vm3, %v490_v40, -inf  ;;  %v495_v43 = vsel %vm235_vm3, %v491_v42, -inf  ;;  %1016 = vmatprep.subr.bf16.mxu1 %v1231_v0 }
 0x628   :  { %493 = vmax.xlane.f32.xlu0 %v492_v41 }
 0x62a   :  { %1017 = vmatpush3.bf16.msra.mxu1 %v1091_v51 }
 0x62b   :  { %1018 = vmatprep.subr.bf16.mxu1 %v1231_v0 }
 0x62c   :  { %496 = vmax.xlane.f32.xlu0 %v495_v43 }
 0x62e   :  { %1019 = vmatpush3.bf16.msra.mxu1 %v1092_v59 }
 0x62f   :  { %1020 = vmatprep.subr.bf16.mxu1 %v1231_v0 }
 0x632   :  { %1021 = vmatpush3.bf16.msra.mxu1 %v1093_v60 }
 0x633   :  { %1022 = vmatprep.subr.bf16.mxu1 %v1231_v0 }
 0x636   :  { %1023 = vmatpush3.bf16.msra.mxu1 %v1094_v61 }
 0x637   :  { %1024 = vmatprep.subr.bf16.mxu1 %v1231_v0 }
 0x63a   :  { %1025 = vmatpush3.bf16.msra.mxu1 %v1095_v62 }
 0x63b   :  { %1026 = vmatprep.subr.bf16.mxu1 %v1231_v0 }
 0x63e   :  { %1027 = vmatpush3.bf16.msra.mxu1 %v1096_v63 }
 0x63f   :  { %1028 = vmatprep.subr.bf16.mxu1 %v1231_v0 }
 0x642   :  { %1029 = vmatpush3.bf16.msra.mxu1 %v1097_v1 }
 0x643   :  { %1054 = vmatprep.subr.bf16.mxu1 %v1231_v0 }
 0x6b5   :  { %v494_v21 = vpop.xlane.xlu0 %493 }
 0x6b6   :  { %v498_v23 = vsub.f32 %v490_v40, %v494_v21 }
 0x6b8   :  { %v500_v44 = vmul.f32 1.442695, %v498_v23 }
 0x6b9   :  { %v497_v45 = vpop.xlane.xlu0 %496 }
 0x6ba   :  { %1118 = vpow2.f32 %v500_v44  ;;  %v499_v46 = vsub.f32 %v491_v42, %v497_v45 }
 0x6bc   :  { %v502_v47 = vmul.f32 1.442695, %v499_v46 }
 0x6be   :  { %1120 = vpow2.f32 %v502_v47  ;;  %v812_v47 = vld [vmem:[%s1419_s4] sm:$0x1] }
 0x6c4   :  { %v1119_v48 = vpop.eup %1118 }
 0x6c5   :  { %v504_v49 = vsel %vm235_vm3, %v1119_v48, 0.0 }
 0x6c6   :  { %505 = vadd.xlane.f32.xlu0 %v504_v49 }
 0x6c8   :  { %v1121_v30 = vpop.eup %1120 }
 0x6c9   :  { %v507_v50 = vsel %vm235_vm3, %v1121_v30, 0.0 }
 0x6ca   :  { %508 = vadd.xlane.f32.xlu0 %v507_v50 }
 0x753   :  { %v506_v52 = vpop.xlane.xlu0 %505 }
 0x754   :  { %1122 = vrcp.f32 %v506_v52 }
 0x757   :  { %v509_v53 = vpop.xlane.xlu0 %508 }
 0x758   :  { %1124 = vrcp.f32 %v509_v53 }
 0x75e   :  { %v1123_v54 = vpop.eup %1122 }
 0x75f   :  { %v512_v56 = vmul.f32 %v1123_v54, %v1119_v48 }
 0x762   :  { %v1125_v55 = vpop.eup %1124 }
 0x763   :  { %v513_v57 = vmul.f32 %v1125_v55, %v1121_v30 }
 0x765   :  { %v514_v58 = vpack.c.bf16 %v513_v57, %v512_v56 }
 0x767   :  { %1011 = vmatmul.mubr.msk.bf16.vlgmr.msra.gmra.mrb[4].mxu0 %vm235_vm3, %v514_v58 }
 0x768   :  { %1050 = vmatprep.mubr.msk.bf16.mxu0 %vm1232_vm0, %v1231_v0  ;;  %1035 = vmatpush3.bf16.msra.mxu0 %v1098_v2 }
 0x769   :  { %1036 = vmatprep.subr.bf16.mxu0 %v1231_v0 }
 0x76c   :  { %1037 = vmatpush3.bf16.msra.mxu0 %v1099_v3 }
 0x76d   :  { %1038 = vmatprep.subr.bf16.mxu0 %v1231_v0 }
 0x770   :  { %1039 = vmatpush3.bf16.msra.mxu0 %v1100_v4 }
 0x771   :  { %1040 = vmatprep.subr.bf16.mxu0 %v1231_v0 }
 0x774   :  { %1041 = vmatpush3.bf16.msra.mxu0 %v1101_v5 }
 0x775   :  { %1042 = vmatprep.subr.bf16.mxu0 %v1231_v0 }
 0x778   :  { %1043 = vmatpush3.bf16.msra.mxu0 %v1102_v6 }
 0x779   :  { %1044 = vmatprep.subr.bf16.mxu0 %v1231_v0 }
 0x77c   :  { %1045 = vmatpush3.bf16.msra.mxu0 %v1103_v7 }
 0x77d   :  { %1046 = vmatprep.subr.bf16.mxu0 %v1231_v0 }
 0x780   :  { %1047 = vmatpush3.bf16.msra.mxu0 %v1104_v28 }
 0x781   :  { %1048 = vmatprep.subr.bf16.mxu0 %v1231_v0 }
 0x784   :  { %1049 = vmatpush3.bf16.msra.mxu0 %v1105_v31 }
 0x83a   :  { %v561_v9 = vpop.f32.mrb[4].mxu0 }
 0x83b   :  { %v562_v10 = vadd.f32 %v895_v8, %v561_v9  ;;  %v1012_v11 = vpop.f32.mrb[5].mxu0 }
 0x83c   :  { %v564_v12 = vpop.f32.mrb[6].mxu0 }
 0x83d   :  { %v570_v13 = vmin.f32 %v562_v10, 0.0  ;;  %v565_v14 = vadd.f32 %v895_v8, %v564_v12  ;;  %v1013_v15 = vpop.f32.mrb[7].mxu0  ;;  %vm568_vm8 = vcmp.gt.f32.partialorder %v562_v10, 0.0 }
 0x83f   :  { %v572_v16 = vmul.f32 1.442695, %v570_v13  ;;  %v571_v17 = vmin.f32 %v565_v14, 0.0  ;;  %vm569_vm9 = vcmp.gt.f32.partialorder %v565_v14, 0.0 }
 0x841   :  { %1126 = vpow2.f32 %v572_v16  ;;  %v574_v18 = vmul.f32 1.442695, %v571_v17 }
 0x843   :  { %1128 = vpow2.f32 %v574_v18 }
 0x84b   :  { %v1127_v19 = vpop.eup %1126 }
 0x84c   :  { %v897_v20 = vadd.f32 -1.0, %v1127_v19 }
 0x84d   :  { %v1129_v22 = vpop.eup %1128 }
 0x84e   :  { %v898_v24 = vadd.f32 -1.0, %v1129_v22  ;;  %v578_v25 = vsel %vm568_vm8, %v562_v10, %v897_v20 }
 0x850   :  { %v579_v26 = vsel %vm569_vm9, %v565_v14, %v898_v24 }
 0x851   :  { %v580_v27 = vpack.c.bf16 %v579_v26, %v578_v25 }
 0x853   :  { %1031 = vmatmul.mubr.bf16.vlgmr.msra.gmra.mrb[8].mxu1 %v580_v27 }
 0x854   :  { %1056 = vmatprep.mubr.msk.bf16.mxu1 %vm1232_vm0, %v1231_v0  ;;  %v910_v0 = vld [vmem:[%s1418_s3 + $0x3] ss:$0 sm:$0xff]  ;;  %s1196_s3 = scalar_lea.vmem %s865_s1, 32 }
 0x855   :  { %p1197_p10 = scmp.ne.s32.totalorder %s865_s1, %s1196_s3  ;;  %p1202_p12 = scmp.lt.s32.totalorder %s1196_s3, %s1196_s3 }
 0x857   :  { %p1203_p13 = por %p1202_p12, %p1201_p11 }
 0x859   :  { %p1204_p0 = pnand %p1203_p13, %p1197_p10 }
 0x926   :  { %v688_v33 = vpop.f32.mrb[8].mxu1 }
 0x927   :  { %v689_v34 = vadd.f32 %v900_v32, %v688_v33  ;;  %v1032_v35 = vpop.f32.mrb[9].mxu1 }
 0x928   :  { %v691_v36 = vpop.f32.mrb[10].mxu1 }
 0x929   :  { %v692_v37 = vadd.f32 %v900_v32, %v691_v36  ;;  %v1033_v38 = vpop.f32.mrb[11].mxu1  ;;  %v695_v39 = vmax.f32 %v689_v34, 0.0 }
 0x92b   :  { %v696_v40 = vmax.f32 %v692_v37, 0.0 }
 0x92d   :  { %v697_v41 = vpack.c.bf16 %v696_v40, %v695_v39 }
 0x92f   :  { %1051 = vmatmul.mubr.bf16.vlgmr.msra.gmra.mrb[8].mxu0 %v697_v41 }
 0xa02   :  { %v805_v42 = vpop.f32.mrb[8].mxu0 }
 0xa03   :  { %v1052_v43 = vpop.f32.mrb[9].mxu0  ;;  %v806_v23 = vadd.f32 %v910_v0, %v805_v42 }
 0xa04   :  { %v808_v21 = vpop.f32.mrb[10].mxu0 }
 0xa05   :  { %v809_v44 = vadd.f32 %v910_v0, %v808_v21  ;;  %v1053_v45 = vpop.f32.mrb[11].mxu0 }
 0xa07   :  { %v813_v46 = vpack.c.bf16 %v809_v44, %v806_v23 }
 0xa09   :  { %1055 = vmatpush3.bf16.msra.mxu1 %v813_v46 }
 0xa0c   :  { %1057 = vmatmul.mubr.msk.bf16.vlgmr.msra.gmra.mrb[12].mxu1 %vm235_vm3, %v812_v47 }
 0xadf   :  { %v851_v48 = vpop.f32.mrb[12].mxu1 }
 0xae0   :  { %857 = vst [vmem:[#allocation8] sm:$0x3] %v851_v48  ;;  %v1058_v49 = vpop.f32.mrb[13].mxu1 }
 0xae1   :  { %v854_v30 = vpop.f32.mrb[14].mxu1 }
 0xae2   :  { %1207 = shalt.err (!%p1204_p0)
}
 0xae3   :  { %s1208_s4 = scalar_lea.hbm %s1420_s5, 32 }
 0xae4   :  { %p1209_p1 = scmp.ne.s32.totalorder %s1420_s5, %s1208_s4  ;;  %p1212_p2 = scmp.lt.u32.totalorder %s1208_s4, %s1420_s5 }
 0xae6   :  { %p1214_p3 = pnand %p1212_p2, %p1209_p1 }
 0xae8   :  { %1217 = shalt.err (!%p1214_p3)
}
 0xae9   :  { %867 = dma.vmem_to_hbm [thread:$0]  %s865_s1, 32, %s1420_s5, [#allocation4]   ;;  %v1059_v50 = vpop.f32.mrb[15].mxu1 }
 0xaea   :  { %1222 = dma.done.wait [#allocation4], 32  }
 0xaeb   :  { %1223 = vsyncadd [#allocation4], 4294967264 }
 0xaec   :  { %871 = vsyncpa [#allocation3], 1 }
 0xaed   :  { %872 = vsyncpa [#allocation6], 1 }
 0xaee   :  { %873 = vsyncpa [#allocation4], 1 }

</bundles_post_ra>
